<compile_context>
chip_gen: v7x
topology: tpu7x:2x2x1
jax: 0.10.0
libtpu: 0.0.40
codegen_flags: <defaults>
</compile_context>

<pallas_src>
import functools

import jax
import jax.numpy as jnp
from jax.experimental import pallas as pl
from jax.experimental.pallas import tpu as pltpu


# ---------------------------------------------------------------------------
# Fused Pallas kernel: gc1 -> ReLU -> (dropout=id) -> gc2 -> log_softmax
# ---------------------------------------------------------------------------

def _gcn_fused_kernel(x_ref, adj_ref, w1_ref, b1_ref, w2_ref, b2_ref, o_ref,
                      *, nclass):
    """All operands are single full-array VMEM tiles (lane-dense, padded)."""
    # ----- Layer 1: h = relu(adj @ (x @ W1) + b1) -----
    s1 = jnp.dot(x_ref[...], w1_ref[...], preferred_element_type=jnp.float32)
    h = jnp.dot(adj_ref[...], s1.astype(jnp.bfloat16),
                preferred_element_type=jnp.float32)
    h = jnp.maximum(h + b1_ref[...], 0.0)

    # TODO(synk): dropout is identity here (training=False / eval mode).

    # ----- Layer 2: logits = adj @ (h @ W2) + b2 -----
    s2 = jnp.dot(h.astype(jnp.bfloat16), w2_ref[...],
                 preferred_element_type=jnp.float32)
    logits = jnp.dot(adj_ref[...], s2.astype(jnp.bfloat16),
                     preferred_element_type=jnp.float32)
    logits = logits + b2_ref[...]

    # ----- Masked log_softmax over the (padded, lane-dense) class dim -----
    col = jax.lax.broadcasted_iota(jnp.int32, logits.shape, 1)
    masked = jnp.where(col < nclass, logits, jnp.float32(-1e30))
    m = jnp.max(masked, axis=-1, keepdims=True)
    z = masked - m
    lse = jnp.log(jnp.sum(jnp.exp(z), axis=-1, keepdims=True))
    o_ref[...] = (z - lse).astype(o_ref.dtype)


# ---------------------------------------------------------------------------
# Wrapper: pad to lane-dense shapes, cast matmul operands to bf16, one call
# ---------------------------------------------------------------------------

def _round_up(v, m):
    return (v + m - 1) // m * m


def gcn_forward(params, x, adj):
    """Full GCN forward pass (eval mode: dropout is identity)."""
    n, f = x.shape
    h = params["w1"].shape[1]
    c = params["w2"].shape[1]

    # Lane-dense padding: every last dim becomes a multiple of 128 so stores
    # are unmasked and the MXU contraction dims are well shaped.
    n_p = _round_up(n, 128)
    f_p = _round_up(f, 128)
    h_p = _round_up(h, 128)
    c_p = _round_up(c, 128)

    def pad2(a, rows, cols):
        return jnp.pad(a, ((0, rows - a.shape[0]), (0, cols - a.shape[1])))

    x_p = pad2(x, n_p, f_p).astype(jnp.bfloat16)
    adj_p = pad2(adj, n_p, n_p).astype(jnp.bfloat16)
    w1_p = pad2(params["w1"], f_p, h_p).astype(jnp.bfloat16)
    w2_p = pad2(params["w2"], h_p, c_p).astype(jnp.bfloat16)
    b1_p = jnp.pad(params["b1"], (0, h_p - h)).reshape(1, h_p).astype(jnp.float32)
    b2_p = jnp.pad(params["b2"], (0, c_p - c)).reshape(1, c_p).astype(jnp.float32)

    kernel = functools.partial(_gcn_fused_kernel, nclass=c)
    out_p = pl.pallas_call(
        kernel,
        out_shape=jax.ShapeDtypeStruct((n_p, c_p), jnp.float32),
        in_specs=[
            pl.BlockSpec((n_p, f_p), lambda: (0, 0)),
            pl.BlockSpec((n_p, n_p), lambda: (0, 0)),
            pl.BlockSpec((f_p, h_p), lambda: (0, 0)),
            pl.BlockSpec((1, h_p), lambda: (0, 0)),
            pl.BlockSpec((h_p, c_p), lambda: (0, 0)),
            pl.BlockSpec((1, c_p), lambda: (0, 0)),
        ],
        out_specs=pl.BlockSpec((n_p, c_p), lambda: (0, 0)),
        compiler_params=pltpu.CompilerParams(
            vmem_limit_bytes=32 * 1024 * 1024),
    )(x_p, adj_p, w1_p, b1_p, w2_p, b2_p)

    return out_p[:n, :c]


# ---------------------------------------------------------------------------
# Pure-JAX reference (same bf16-input / f32-accumulation recipe as the kernel)
# ---------------------------------------------------------------------------

def gcn_forward_ref(params, x, adj):
    bf = jnp.bfloat16
    x_b, adj_b = x.astype(bf), adj.astype(bf)
    w1_b, w2_b = params["w1"].astype(bf), params["w2"].astype(bf)

    s1 = jnp.dot(x_b, w1_b, preferred_element_type=jnp.float32)
    h = jnp.maximum(
        jnp.dot(adj_b, s1.astype(bf), preferred_element_type=jnp.float32)
        + params["b1"], 0.0)
    s2 = jnp.dot(h.astype(bf), w2_b, preferred_element_type=jnp.float32)
    logits = (jnp.dot(adj_b, s2.astype(bf), preferred_element_type=jnp.float32)
              + params["b2"])
    return jax.nn.log_softmax(logits, axis=1)


# ---------------------------------------------------------------------------
# Deterministic setup + run
# ---------------------------------------------------------------------------

def init_params(key, nfeat, nhid, nclass):
    k1, k2, k3, k4 = jax.random.split(key, 4)
    # Kipf GraphConvolution init: uniform(-1/sqrt(out), 1/sqrt(out))
    s1 = 1.0 / jnp.sqrt(jnp.float32(nhid))
    s2 = 1.0 / jnp.sqrt(jnp.float32(nclass))
    return {
        "w1": jax.random.uniform(k1, (nfeat, nhid), jnp.float32, -s1, s1),
        "b1": jax.random.uniform(k2, (nhid,), jnp.float32, -s1, s1),
        "w2": jax.random.uniform(k3, (nhid, nclass), jnp.float32, -s2, s2),
        "b2": jax.random.uniform(k4, (nclass,), jnp.float32, -s2, s2),
    }


if __name__ == "__main__":
    nfeat, nhid, nclass = 16, 32, 8
    n_nodes = 8
    dropout = 0.5  # unused in eval mode

    key = jax.random.PRNGKey(0)
    kx, ka, kp = jax.random.split(key, 3)

    x = jax.random.normal(kx, (n_nodes, nfeat), jnp.float32)

    # Symmetric normalized adjacency with self-loops (standard GCN preprocessing).
    a_raw = (jax.random.uniform(ka, (n_nodes, n_nodes)) > 0.7).astype(jnp.float32)
    a = jnp.maximum(a_raw, a_raw.T) + jnp.eye(n_nodes, dtype=jnp.float32)
    deg_inv_sqrt = 1.0 / jnp.sqrt(jnp.sum(a, axis=1))
    adj = a * deg_inv_sqrt[:, None] * deg_inv_sqrt[None, :]

    params = init_params(kp, nfeat, nhid, nclass)

    fwd = jax.jit(gcn_forward)
    out = fwd(params, x, adj)
    out = jax.block_until_ready(out)

    ref = gcn_forward_ref(params, x, adj)
    assert out.shape == (n_nodes, nclass)
    assert jnp.allclose(out, ref, atol=2e-3, rtol=2e-3), "mismatch vs reference"

    print("KERNEL_OK")
</pallas_src>

<mosaic_0001>
module attributes {stable_mosaic.version = 11 : i64} {
  func.func @_gcn_fused_kernel(%arg0: memref<128x128xbf16, #tpu.memory_space<vmem>>, %arg1: memref<128x128xbf16, #tpu.memory_space<vmem>>, %arg2: memref<128x128xbf16, #tpu.memory_space<vmem>>, %arg3: memref<1x128xf32, #tpu.memory_space<vmem>>, %arg4: memref<128x128xbf16, #tpu.memory_space<vmem>>, %arg5: memref<1x128xf32, #tpu.memory_space<vmem>>, %arg6: memref<128x128xf32, #tpu.memory_space<vmem>>) attributes {dimension_semantics = [], scalar_prefetch = 0 : i64, scratch_operands = 0 : i64, tpu.core_type = #tpu.core_type<tc>} {
    %c0 = arith.constant 0 : index
    %c0_0 = arith.constant 0 : index
    %0 = vector.load %arg0[%c0, %c0_0] : memref<128x128xbf16, #tpu.memory_space<vmem>>, vector<128x128xbf16>
    %c0_1 = arith.constant 0 : index
    %c0_2 = arith.constant 0 : index
    %1 = vector.load %arg2[%c0_1, %c0_2] : memref<128x128xbf16, #tpu.memory_space<vmem>>, vector<128x128xbf16>
    %cst = arith.constant dense<0.000000e+00> : vector<128x128xf32>
    %2 = tpu.matmul %0, %1, %cst {dimension_numbers = #tpu.dot_dimension_numbers<[1], [0], [0], [1], [0, 0, 1, 1], [], []>} : vector<128x128xbf16>, vector<128x128xbf16>, vector<128x128xf32> -> vector<128x128xf32>
    %c0_3 = arith.constant 0 : index
    %c0_4 = arith.constant 0 : index
    %3 = vector.load %arg1[%c0_3, %c0_4] : memref<128x128xbf16, #tpu.memory_space<vmem>>, vector<128x128xbf16>
    %4 = arith.truncf %2 : vector<128x128xf32> to vector<128x128xbf16>
    %cst_5 = arith.constant dense<0.000000e+00> : vector<128x128xf32>
    %5 = tpu.matmul %3, %4, %cst_5 {dimension_numbers = #tpu.dot_dimension_numbers<[1], [0], [0], [1], [0, 0, 1, 1], [], []>} : vector<128x128xbf16>, vector<128x128xbf16>, vector<128x128xf32> -> vector<128x128xf32>
    %c0_6 = arith.constant 0 : index
    %c0_7 = arith.constant 0 : index
    %6 = vector.load %arg3[%c0_6, %c0_7] : memref<1x128xf32, #tpu.memory_space<vmem>>, vector<1x128xf32>
    %7 = vector.broadcast %6 : vector<1x128xf32> to vector<128x128xf32>
    %8 = arith.addf %5, %7 : vector<128x128xf32>
    %cst_8 = arith.constant 0.000000e+00 : f32
    %9 = vector.broadcast %cst_8 : f32 to vector<128x128xf32>
    %10 = arith.maximumf %8, %9 : vector<128x128xf32>
    %11 = arith.truncf %10 : vector<128x128xf32> to vector<128x128xbf16>
    %c0_9 = arith.constant 0 : index
    %c0_10 = arith.constant 0 : index
    %12 = vector.load %arg4[%c0_9, %c0_10] : memref<128x128xbf16, #tpu.memory_space<vmem>>, vector<128x128xbf16>
    %cst_11 = arith.constant dense<0.000000e+00> : vector<128x128xf32>
    %13 = tpu.matmul %11, %12, %cst_11 {dimension_numbers = #tpu.dot_dimension_numbers<[1], [0], [0], [1], [0, 0, 1, 1], [], []>} : vector<128x128xbf16>, vector<128x128xbf16>, vector<128x128xf32> -> vector<128x128xf32>
    %c0_12 = arith.constant 0 : index
    %c0_13 = arith.constant 0 : index
    %14 = vector.load %arg1[%c0_12, %c0_13] : memref<128x128xbf16, #tpu.memory_space<vmem>>, vector<128x128xbf16>
    %15 = arith.truncf %13 : vector<128x128xf32> to vector<128x128xbf16>
    %cst_14 = arith.constant dense<0.000000e+00> : vector<128x128xf32>
    %16 = tpu.matmul %14, %15, %cst_14 {dimension_numbers = #tpu.dot_dimension_numbers<[1], [0], [0], [1], [0, 0, 1, 1], [], []>} : vector<128x128xbf16>, vector<128x128xbf16>, vector<128x128xf32> -> vector<128x128xf32>
    %c0_15 = arith.constant 0 : index
    %c0_16 = arith.constant 0 : index
    %17 = vector.load %arg5[%c0_15, %c0_16] : memref<1x128xf32, #tpu.memory_space<vmem>>, vector<1x128xf32>
    %18 = vector.broadcast %17 : vector<1x128xf32> to vector<128x128xf32>
    %19 = arith.addf %16, %18 : vector<128x128xf32>
    %20 = tpu.iota {dimensions = array<i32: 1>} : vector<128x128xi32>
    %c8_i32 = arith.constant 8 : i32
    %21 = vector.broadcast %c8_i32 : i32 to vector<128x128xi32>
    %22 = arith.cmpi slt, %20, %21 : vector<128x128xi32>
    %cst_17 = arith.constant -1.000000e+30 : f32
    %23 = vector.broadcast %cst_17 : f32 to vector<128x128xf32>
    %24 = arith.select %22, %19, %23 : vector<128x128xi1>, vector<128x128xf32>
    %cst_18 = arith.constant dense<0xFF800000> : vector<128xf32>
    %25 = vector.multi_reduction <maximumf>, %24, %cst_18 [1] : vector<128x128xf32> to vector<128xf32>
    %26 = vector.shape_cast %25 : vector<128xf32> to vector<128x1xf32>
    %27 = vector.broadcast %26 : vector<128x1xf32> to vector<128x128xf32>
    %28 = arith.subf %24, %27 : vector<128x128xf32>
    %29 = math.exp %28 : vector<128x128xf32>
    %cst_19 = arith.constant dense<0.000000e+00> : vector<128xf32>
    %30 = vector.multi_reduction <add>, %29, %cst_19 [1] : vector<128x128xf32> to vector<128xf32>
    %31 = vector.shape_cast %30 : vector<128xf32> to vector<128x1xf32>
    %32 = math.log %31 : vector<128x1xf32>
    %33 = vector.broadcast %32 : vector<128x1xf32> to vector<128x128xf32>
    %34 = arith.subf %28, %33 : vector<128x128xf32>
    %c0_20 = arith.constant 0 : index
    %c0_21 = arith.constant 0 : index
    %35 = vector.load %arg6[%c0_20, %c0_21] : memref<128x128xf32, #tpu.memory_space<vmem>>, vector<128x128xf32>
    tpu.vector_store %arg6[%c0_20, %c0_21], %34 {strides = array<i32>} : memref<128x128xf32, #tpu.memory_space<vmem>>, vector<128x128xf32>,
    return
  }
}

</mosaic_0001>

<bundles_post_ra>
// kernel: gcn_forward.1
= control target key start
LH: loop header
LB: loop body
LE: loop exit
PB: predicated region body
PF: predicated region fallthrough
CT: control target
= control target key end

     0   :  { %s1583_s2 = inlined_call_operand.vmem [shape: bf16[128,128], index: 2, kind: input, shape index: {}]   ;;  %s1584_s0 = inlined_call_operand.vmem [shape: bf16[128,128], index: 0, kind: input, shape index: {}]   ;;  %s1585_s1 = inlined_call_operand.vmem [shape: bf16[128,128], index: 1, kind: input, shape index: {}]   ;;  %s1586_s4 = inlined_call_operand.vmem [shape: bf16[128,128], index: 4, kind: input, shape index: {}]   ;;  %s1587_s3 = inlined_call_operand.vmem [shape: f32[1,128], index: 3, kind: input, shape index: {}]   ;;  %s1588_s5 = inlined_call_operand.vmem [shape: f32[1,128], index: 5, kind: input, shape index: {}]   ;;  %s1589_s6 = inlined_call_operand.vmem [shape: f32[128,128], index: 6, kind: output, shape index: {}]  }
   0x1   :  { %v1147_v0 = vld [vmem:[%s1583_s2] sm:$0xff]   ;;  %v1148_v1 = vld [vmem:[%s1583_s2 + $0x8] sm:$0xff]   ;;  %v1149_v2 = vld [vmem:[%s1583_s2 + $0x10] sm:$0xff]  }
   0x2   :  { %1019 = vmatprep.subr.bf16.mxu0 %v1147_v0  ;;  %v1150_v3 = vld [vmem:[%s1583_s2 + $0x18] sm:$0xff]   ;;  %v1155_v4 = vld [vmem:[%s1584_s0] sm:$0xff]   ;;  %v1152_v6 = vld [vmem:[%s1583_s2 + $0x28] sm:$0xff]  }
   0x3   :  { %1020 = vmatpush3.bf16.msra.mxu0 %v1147_v0  ;;  %1035 = vmatprep.mubr.bf16.mxu0 %v1155_v4  ;;  %v1151_v5 = vld [vmem:[%s1583_s2 + $0x20] sm:$0xff]   ;;  %v1153_v7 = vld [vmem:[%s1583_s2 + $0x30] sm:$0xff]   ;;  %v1154_v8 = vld [vmem:[%s1583_s2 + $0x38] sm:$0xff]  }
   0x4   :  { %1021 = vmatprep.subr.bf16.mxu0 %v1148_v1  ;;  %v1156_v9 = vld [vmem:[%s1584_s0 + $0x8] sm:$0xff]   ;;  %v1157_v10 = vld [vmem:[%s1584_s0 + $0x10] sm:$0xff]   ;;  %v1158_v11 = vld [vmem:[%s1584_s0 + $0x18] sm:$0xff]  }
   0x5   :  { %v1159_v12 = vld [vmem:[%s1584_s0 + $0x20] sm:$0xff]   ;;  %v1160_v13 = vld [vmem:[%s1584_s0 + $0x28] sm:$0xff]   ;;  %v1161_v14 = vld [vmem:[%s1584_s0 + $0x30] sm:$0xff]  }
   0x6   :  { %v1162_v15 = vld [vmem:[%s1584_s0 + $0x38] sm:$0xff]   ;;  %v1329_v16 = vld [vmem:[%s1585_s1] sm:$0xff]   ;;  %v1172_v18 = vld [vmem:[%s1586_s4 + $0x8] sm:$0xff]  }
   0x7   :  { %1022 = vmatpush3.bf16.msra.mxu0 %v1148_v1  ;;  %1067 = vmatprep.mubr.bf16.mxu1 %v1329_v16  ;;  %v1171_v17 = vld [vmem:[%s1586_s4] sm:$0xff]   ;;  %v1173_v19 = vld [vmem:[%s1586_s4 + $0x10] sm:$0xff]   ;;  %v1174_v20 = vld [vmem:[%s1586_s4 + $0x18] sm:$0xff]  }
   0x8   :  { %1023 = vmatprep.subr.bf16.mxu0 %v1149_v2  ;;  %v1175_v21 = vld [vmem:[%s1586_s4 + $0x20] sm:$0xff]   ;;  %v1176_v22 = vld [vmem:[%s1586_s4 + $0x28] sm:$0xff]   ;;  %v1358_v48 = vld [vmem:[%s1585_s1 + $0x10] sm:$0xff]  }
   0x9   :  { %v1353_v47 = vld [vmem:[%s1585_s1 + $0x8] sm:$0xff]   ;;  %v1365_v49 = vld [vmem:[%s1585_s1 + $0x18] sm:$0xff]   ;;  %v1370_v50 = vld [vmem:[%s1585_s1 + $0x20] sm:$0xff]  }
   0xa   :  { %v1377_v51 = vld [vmem:[%s1585_s1 + $0x28] sm:$0xff]   ;;  %v1382_v52 = vld [vmem:[%s1585_s1 + $0x30] sm:$0xff]   ;;  %v1389_v53 = vld [vmem:[%s1585_s1 + $0x38] sm:$0xff]  }
   0xb   :  { %1024 = vmatpush3.bf16.msra.mxu0 %v1149_v2  ;;  %v1177_v54 = vld [vmem:[%s1586_s4 + $0x30] sm:$0xff]   ;;  %v1178_v55 = vld [vmem:[%s1586_s4 + $0x38] sm:$0xff]   ;;  %v937_v56 = vld [vmem:[%s1587_s3] ss:$0 sm:$0xff] }
   0xc   :  { %1025 = vmatprep.subr.bf16.mxu0 %v1150_v3 }
   0xf   :  { %1026 = vmatpush3.bf16.msra.mxu0 %v1150_v3 }
  0x10   :  { %1027 = vmatprep.subr.bf16.mxu0 %v1151_v5 }
  0x13   :  { %1028 = vmatpush3.bf16.msra.mxu0 %v1151_v5 }
  0x14   :  { %1029 = vmatprep.subr.bf16.mxu0 %v1152_v6 }
  0x17   :  { %1030 = vmatpush3.bf16.msra.mxu0 %v1152_v6 }
  0x18   :  { %1031 = vmatprep.subr.bf16.mxu0 %v1153_v7 }
  0x1b   :  { %1032 = vmatpush3.bf16.msra.mxu0 %v1153_v7 }
  0x1c   :  { %1033 = vmatprep.subr.bf16.mxu0 %v1154_v8 }
  0x1f   :  { %1034 = vmatpush3.bf16.msra.mxu0 %v1154_v8 }
  0x20   :  { %1083 = vmatprep.subr.bf16.mxu0 %v1171_v17 }
  0x22   :  { %1036 = vmatmul.mubr.bf16.vlgmr.msra.gmra.mrb[0].mxu0 %v1156_v9 }
  0x23   :  { %1039 = vmatprep.mubr.bf16.mxu0 %v1157_v10  ;;  %1084 = vmatpush3.bf16.msra.mxu0 %v1171_v17 }
  0x24   :  { %1085 = vmatprep.subr.bf16.mxu0 %v1172_v18 }
  0x27   :  { %1086 = vmatpush3.bf16.msra.mxu0 %v1172_v18 }
  0x28   :  { %1087 = vmatprep.subr.bf16.mxu0 %v1173_v19 }
  0x2a   :  { %1040 = vmatmul.mubr.bf16.gmra.mrb[4].mxu0 %v1158_v11 }
  0x2b   :  { %1043 = vmatprep.mubr.bf16.mxu0 %v1159_v12  ;;  %1088 = vmatpush3.bf16.msra.mxu0 %v1173_v19 }
  0x2c   :  { %1089 = vmatprep.subr.bf16.mxu0 %v1174_v20 }
  0x2f   :  { %1090 = vmatpush3.bf16.msra.mxu0 %v1174_v20 }
  0x30   :  { %1091 = vmatprep.subr.bf16.mxu0 %v1175_v21 }
  0x32   :  { %1044 = vmatmul.mubr.bf16.gmra.mrb[8].mxu0 %v1160_v13 }
  0x33   :  { %1047 = vmatprep.mubr.bf16.mxu0 %v1161_v14  ;;  %1092 = vmatpush3.bf16.msra.mxu0 %v1175_v21 }
  0x34   :  { %1093 = vmatprep.subr.bf16.mxu0 %v1176_v22 }
  0x37   :  { %1094 = vmatpush3.bf16.msra.mxu0 %v1176_v22 }
  0x38   :  { %1095 = vmatprep.subr.bf16.mxu0 %v1177_v54 }
  0x3a   :  { %1048 = vmatmul.mubr.bf16.gmra.mrb[12].mxu0 %v1162_v15 }
  0x3b   :  { %1096 = vmatpush3.bf16.msra.mxu0 %v1177_v54 }
  0x3c   :  { %1097 = vmatprep.subr.bf16.mxu0 %v1178_v55 }
  0x3f   :  { %1098 = vmatpush3.bf16.msra.mxu0 %v1178_v55 }
  0xf5   :  { %v1037_v23 = vpop.f32.mrb[0].mxu0 }
  0xf6   :  { %v186_v24 = vpop.f32.mrb[1].mxu0 }
  0xf7   :  { %v1038_v25 = vpop.f32.mrb[2].mxu0 }
  0xf8   :  { %v266_v26 = vpack.c.bf16 %v1038_v25, %v1037_v23  ;;  %v189_v27 = vpop.f32.mrb[3].mxu0 }
  0xf9   :  { %v265_v28 = vpack.c.bf16 %v189_v27, %v186_v24 }
  0xfb   :  { %1051 = vmatprep.subr.bf16.mxu1 %v265_v28 }
  0xfc   :  { %1052 = vmatpush3.bf16.msra.mxu1 %v265_v28 }
  0xfd   :  { %v1041_v29 = vpop.f32.mrb[4].mxu0  ;;  %1053 = vmatprep.subr.bf16.mxu1 %v266_v26 }
  0xfe   :  { %v202_v30 = vpop.f32.mrb[5].mxu0 }
  0xff   :  { %v1042_v31 = vpop.f32.mrb[6].mxu0 }
 0x100   :  { %v268_v32 = vpack.c.bf16 %v1042_v31, %v1041_v29  ;;  %v205_v33 = vpop.f32.mrb[7].mxu0  ;;  %1054 = vmatpush3.bf16.msra.mxu1 %v266_v26 }
 0x101   :  { %v267_v34 = vpack.c.bf16 %v205_v33, %v202_v30 }
 0x103   :  { %1055 = vmatprep.subr.bf16.mxu1 %v267_v34 }
 0x104   :  { %1056 = vmatpush3.bf16.msra.mxu1 %v267_v34 }
 0x105   :  { %v1045_v35 = vpop.f32.mrb[8].mxu0  ;;  %1057 = vmatprep.subr.bf16.mxu1 %v268_v32 }
 0x106   :  { %v218_v36 = vpop.f32.mrb[9].mxu0 }
 0x107   :  { %v1046_v37 = vpop.f32.mrb[10].mxu0 }
 0x108   :  { %v270_v38 = vpack.c.bf16 %v1046_v37, %v1045_v35  ;;  %v221_v39 = vpop.f32.mrb[11].mxu0  ;;  %1058 = vmatpush3.bf16.msra.mxu1 %v268_v32 }
 0x109   :  { %v269_v40 = vpack.c.bf16 %v221_v39, %v218_v36 }
 0x10b   :  { %1059 = vmatprep.subr.bf16.mxu1 %v269_v40 }
 0x10c   :  { %1060 = vmatpush3.bf16.msra.mxu1 %v269_v40 }
 0x10d   :  { %v1049_v41 = vpop.f32.mrb[12].mxu0  ;;  %1061 = vmatprep.subr.bf16.mxu1 %v270_v38 }
 0x10e   :  { %v234_v42 = vpop.f32.mrb[13].mxu0 }
 0x10f   :  { %v1050_v43 = vpop.f32.mrb[14].mxu0 }
 0x110   :  { %v272_v44 = vpack.c.bf16 %v1050_v43, %v1049_v41  ;;  %v237_v45 = vpop.f32.mrb[15].mxu0  ;;  %1062 = vmatpush3.bf16.msra.mxu1 %v270_v38 }
 0x111   :  { %v271_v46 = vpack.c.bf16 %v237_v45, %v234_v42 }
 0x113   :  { %1063 = vmatprep.subr.bf16.mxu1 %v271_v46 }
 0x114   :  { %1064 = vmatpush3.bf16.msra.mxu1 %v271_v46 }
 0x115   :  { %1065 = vmatprep.subr.bf16.mxu1 %v272_v44 }
 0x118   :  { %1066 = vmatpush3.bf16.msra.mxu1 %v272_v44 }
 0x11b   :  { %1068 = vmatmul.mubr.bf16.vlgmr.msra.gmra.mrb[0].mxu1 %v1353_v47 }
 0x11c   :  { %1071 = vmatprep.mubr.bf16.mxu1 %v1358_v48 }
 0x123   :  { %1072 = vmatmul.mubr.bf16.gmra.mrb[4].mxu1 %v1365_v49 }
 0x124   :  { %1075 = vmatprep.mubr.bf16.mxu1 %v1370_v50 }
 0x12b   :  { %1076 = vmatmul.mubr.bf16.gmra.mrb[8].mxu1 %v1377_v51 }
 0x12c   :  { %1079 = vmatprep.mubr.bf16.mxu1 %v1382_v52 }
 0x133   :  { %1080 = vmatmul.mubr.bf16.gmra.mrb[12].mxu1 %v1389_v53 }
 0x134   :  { %1131 = vmatprep.mubr.bf16.mxu1 %v1329_v16 }
 0x1ee   :  { %v1069_v57 = vpop.f32.mrb[0].mxu1 }
 0x1ef   :  { %v371_v58 = vadd.f32 %v1069_v57, %v937_v56  ;;  %v362_v59 = vpop.f32.mrb[1].mxu1 }
 0x1f0   :  { %v363_v60 = vadd.f32 %v937_v56, %v362_v59  ;;  %v1070_v61 = vpop.f32.mrb[2].mxu1 }
 0x1f1   :  { %v374_v62 = vadd.f32 %v1070_v61, %v937_v56  ;;  %v365_v63 = vpop.f32.mrb[3].mxu1  ;;  %v427_v1 = vmax.f32 %v371_v58, 0.0 }
 0x1f2   :  { %v366_v0 = vadd.f32 %v937_v56, %v365_v63  ;;  %v425_v3 = vmax.f32 %v363_v60, 0.0 }
 0x1f3   :  { %v428_v2 = vmax.f32 %v374_v62, 0.0 }
 0x1f4   :  { %v426_v4 = vmax.f32 %v366_v0, 0.0 }
 0x1f5   :  { %v442_v5 = vpack.c.bf16 %v428_v2, %v427_v1 }
 0x1f6   :  { %v441_v6 = vpack.c.bf16 %v426_v4, %v425_v3  ;;  %v1073_v7 = vpop.f32.mrb[4].mxu1 }
 0x1f7   :  { %v387_v8 = vadd.f32 %v1073_v7, %v937_v56  ;;  %v378_v9 = vpop.f32.mrb[5].mxu1 }
 0x1f8   :  { %v379_v10 = vadd.f32 %v937_v56, %v378_v9  ;;  %v1074_v11 = vpop.f32.mrb[6].mxu1  ;;  %1099 = vmatprep.mubr.bf16.mxu0 %v441_v6 }
 0x1f9   :  { %v390_v12 = vadd.f32 %v1074_v11, %v937_v56  ;;  %v381_v13 = vpop.f32.mrb[7].mxu1  ;;  %1100 = vmatmul.mubr.bf16.vlgmr.msra.gmra.mrb[16].mxu0 %v442_v5  ;;  %v431_v15 = vmax.f32 %v387_v8, 0.0 }
 0x1fa   :  { %v382_v14 = vadd.f32 %v937_v56, %v381_v13  ;;  %v429_v17 = vmax.f32 %v379_v10, 0.0 }
 0x1fb   :  { %v432_v16 = vmax.f32 %v390_v12, 0.0 }
 0x1fc   :  { %v430_v18 = vmax.f32 %v382_v14, 0.0 }
 0x1fd   :  { %v444_v19 = vpack.c.bf16 %v432_v16, %v431_v15  ;;  %v722_v16 = vlaneseq }
 0x1fe   :  { %v443_v20 = vpack.c.bf16 %v430_v18, %v429_v17  ;;  %v1077_v21 = vpop.f32.mrb[8].mxu1  ;;  %v954_v18 = vld [vmem:[%s1588_s5] ss:$0 sm:$0xff] }
 0x1ff   :  { %v403_v22 = vadd.f32 %v1077_v21, %v937_v56  ;;  %v394_v23 = vpop.f32.mrb[9].mxu1  ;;  %v1409_v17 = vand.u32 127, %v722_v16 }
 0x200   :  { %v395_v24 = vadd.f32 %v937_v56, %v394_v23  ;;  %v1078_v25 = vpop.f32.mrb[10].mxu1  ;;  %1103 = vmatprep.mubr.bf16.mxu0 %v443_v20 }
 0x201   :  { %v406_v26 = vadd.f32 %v1078_v25, %v937_v56  ;;  %v397_v27 = vpop.f32.mrb[11].mxu1  ;;  %1104 = vmatmul.mubr.bf16.gmra.mrb[20].mxu0 %v444_v19  ;;  %v435_v29 = vmax.f32 %v403_v22, 0.0  ;;  %vm724_vm0 = vcmp.lt.s32.totalorder %v1409_v17, 8 }
 0x202   :  { %v398_v28 = vadd.f32 %v937_v56, %v397_v27  ;;  %v433_v31 = vmax.f32 %v395_v24, 0.0 }
 0x203   :  { %v436_v30 = vmax.f32 %v406_v26, 0.0 }
 0x204   :  { %v434_v32 = vmax.f32 %v398_v28, 0.0 }
 0x205   :  { %v446_v33 = vpack.c.bf16 %v436_v30, %v435_v29 }
 0x206   :  { %v445_v34 = vpack.c.bf16 %v434_v32, %v433_v31  ;;  %v1081_v35 = vpop.f32.mrb[12].mxu1 }
 0x207   :  { %v419_v36 = vadd.f32 %v1081_v35, %v937_v56  ;;  %v410_v37 = vpop.f32.mrb[13].mxu1 }
 0x208   :  { %v411_v38 = vadd.f32 %v937_v56, %v410_v37  ;;  %v1082_v39 = vpop.f32.mrb[14].mxu1  ;;  %1107 = vmatprep.mubr.bf16.mxu0 %v445_v34 }
 0x209   :  { %v422_v40 = vadd.f32 %v1082_v39, %v937_v56  ;;  %v413_v41 = vpop.f32.mrb[15].mxu1  ;;  %1108 = vmatmul.mubr.bf16.gmra.mrb[24].mxu0 %v446_v33  ;;  %v439_v43 = vmax.f32 %v419_v36, 0.0 }
 0x20a   :  { %v414_v42 = vadd.f32 %v937_v56, %v413_v41  ;;  %v437_v45 = vmax.f32 %v411_v38, 0.0 }
 0x20b   :  { %v440_v44 = vmax.f32 %v422_v40, 0.0 }
 0x20c   :  { %v438_v46 = vmax.f32 %v414_v42, 0.0 }
 0x20d   :  { %v448_v54 = vpack.c.bf16 %v440_v44, %v439_v43 }
 0x20e   :  { %v447_v55 = vpack.c.bf16 %v438_v46, %v437_v45 }
 0x210   :  { %1111 = vmatprep.mubr.bf16.mxu0 %v447_v55 }
 0x211   :  { %1112 = vmatmul.mubr.bf16.gmra.mrb[28].mxu0 %v448_v54 }
 0x2cc   :  { %v1101_v57 = vpop.f32.mrb[16].mxu0 }
 0x2cd   :  { %v547_v58 = vpop.f32.mrb[17].mxu0 }
 0x2ce   :  { %v1102_v59 = vpop.f32.mrb[18].mxu0 }
 0x2cf   :  { %v611_v60 = vpack.c.bf16 %v1102_v59, %v1101_v57  ;;  %v550_v61 = vpop.f32.mrb[19].mxu0 }
 0x2d0   :  { %v610_v62 = vpack.c.bf16 %v550_v61, %v547_v58 }
 0x2d2   :  { %1115 = vmatprep.subr.bf16.mxu1 %v610_v62 }
 0x2d3   :  { %1116 = vmatpush3.bf16.msra.mxu1 %v610_v62 }
 0x2d4   :  { %v1105_v63 = vpop.f32.mrb[20].mxu0  ;;  %1117 = vmatprep.subr.bf16.mxu1 %v611_v60 }
 0x2d5   :  { %v563_v0 = vpop.f32.mrb[21].mxu0 }
 0x2d6   :  { %v1106_v56 = vpop.f32.mrb[22].mxu0 }
 0x2d7   :  { %v613_v1 = vpack.c.bf16 %v1106_v56, %v1105_v63  ;;  %v566_v2 = vpop.f32.mrb[23].mxu0  ;;  %1118 = vmatpush3.bf16.msra.mxu1 %v611_v60 }
 0x2d8   :  { %v612_v3 = vpack.c.bf16 %v566_v2, %v563_v0 }
 0x2da   :  { %1119 = vmatprep.subr.bf16.mxu1 %v612_v3 }
 0x2db   :  { %1120 = vmatpush3.bf16.msra.mxu1 %v612_v3 }
 0x2dc   :  { %v1109_v4 = vpop.f32.mrb[24].mxu0  ;;  %1121 = vmatprep.subr.bf16.mxu1 %v613_v1 }
 0x2dd   :  { %v579_v5 = vpop.f32.mrb[25].mxu0 }
 0x2de   :  { %v1110_v6 = vpop.f32.mrb[26].mxu0 }
 0x2df   :  { %v615_v7 = vpack.c.bf16 %v1110_v6, %v1109_v4  ;;  %v582_v8 = vpop.f32.mrb[27].mxu0  ;;  %1122 = vmatpush3.bf16.msra.mxu1 %v613_v1 }
 0x2e0   :  { %v614_v9 = vpack.c.bf16 %v582_v8, %v579_v5 }
 0x2e2   :  { %1123 = vmatprep.subr.bf16.mxu1 %v614_v9 }
 0x2e3   :  { %1124 = vmatpush3.bf16.msra.mxu1 %v614_v9 }
 0x2e4   :  { %v1113_v10 = vpop.f32.mrb[28].mxu0  ;;  %1125 = vmatprep.subr.bf16.mxu1 %v615_v7 }
 0x2e5   :  { %v595_v11 = vpop.f32.mrb[29].mxu0 }
 0x2e6   :  { %v1114_v12 = vpop.f32.mrb[30].mxu0 }
 0x2e7   :  { %v617_v13 = vpack.c.bf16 %v1114_v12, %v1113_v10  ;;  %v598_v14 = vpop.f32.mrb[31].mxu0  ;;  %1126 = vmatpush3.bf16.msra.mxu1 %v615_v7 }
 0x2e8   :  { %v616_v15 = vpack.c.bf16 %v598_v14, %v595_v11 }
 0x2ea   :  { %1127 = vmatprep.subr.bf16.mxu1 %v616_v15 }
 0x2eb   :  { %1128 = vmatpush3.bf16.msra.mxu1 %v616_v15 }
 0x2ec   :  { %1129 = vmatprep.subr.bf16.mxu1 %v617_v13 }
 0x2ef   :  { %1130 = vmatpush3.bf16.msra.mxu1 %v617_v13 }
 0x2f2   :  { %1132 = vmatmul.mubr.bf16.vlgmr.msra.gmra.mrb[16].mxu1 %v1353_v47 }
 0x2f3   :  { %1135 = vmatprep.mubr.bf16.mxu1 %v1358_v48 }
 0x2fa   :  { %1136 = vmatmul.mubr.bf16.gmra.mrb[20].mxu1 %v1365_v49 }
 0x2fb   :  { %1139 = vmatprep.mubr.bf16.mxu1 %v1370_v50 }
 0x302   :  { %1140 = vmatmul.mubr.bf16.gmra.mrb[24].mxu1 %v1377_v51 }
 0x303   :  { %1143 = vmatprep.mubr.bf16.mxu1 %v1382_v52 }
 0x30a   :  { %1144 = vmatmul.mubr.bf16.gmra.mrb[28].mxu1 %v1389_v53 }
 0x3c5   :  { %v1133_v47 = vpop.f32.mrb[16].mxu1 }
 0x3c6   :  { %v668_v48 = vadd.f32 %v1133_v47, %v954_v18  ;;  %v659_v49 = vpop.f32.mrb[17].mxu1 }
 0x3c7   :  { %v660_v19 = vadd.f32 %v954_v18, %v659_v49  ;;  %v1134_v50 = vpop.f32.mrb[18].mxu1 }
 0x3c8   :  { %v671_v20 = vadd.f32 %v1134_v50, %v954_v18  ;;  %v662_v51 = vpop.f32.mrb[19].mxu1  ;;  %v727_v52 = vsel %vm724_vm0, %v668_v48, -1e+30 }
 0x3c9   :  { %v663_v53 = vadd.f32 %v954_v18, %v662_v51  ;;  %745 = vmax.xlane.f32.xlu1 %v727_v52  ;;  %v725_v21 = vsel %vm724_vm0, %v660_v19, -1e+30 }
 0x3ca   :  { %741 = vmax.xlane.f32.xlu0 %v725_v21  ;;  %v728_v22 = vsel %vm724_vm0, %v671_v20, -1e+30 }
 0x3cb   :  { %v726_v24 = vsel %vm724_vm0, %v663_v53, -1e+30 }
 0x3cd   :  { %747 = vmax.xlane.f32.xlu1 %v728_v22  ;;  %v1137_v23 = vpop.f32.mrb[20].mxu1 }
 0x3ce   :  { %v684_v25 = vadd.f32 %v1137_v23, %v954_v18  ;;  %v675_v26 = vpop.f32.mrb[21].mxu1  ;;  %743 = vmax.xlane.f32.xlu0 %v726_v24 }
 0x3cf   :  { %v1138_v27 = vpop.f32.mrb[22].mxu1  ;;  %v676_v31 = vadd.f32 %v954_v18, %v675_v26 }
 0x3d0   :  { %v687_v28 = vadd.f32 %v1138_v27, %v954_v18  ;;  %v678_v29 = vpop.f32.mrb[23].mxu1  ;;  %v731_v30 = vsel %vm724_vm0, %v684_v25, -1e+30 }
 0x3d1   :  { %v679_v32 = vadd.f32 %v954_v18, %v678_v29  ;;  %v729_v35 = vsel %vm724_vm0, %v676_v31, -1e+30 }
 0x3d2   :  { %753 = vmax.xlane.f32.xlu0 %v731_v30  ;;  %v732_v33 = vsel %vm724_vm0, %v687_v28, -1e+30 }
 0x3d3   :  { %755 = vmax.xlane.f32.xlu1 %v732_v33  ;;  %v730_v38 = vsel %vm724_vm0, %v679_v32, -1e+30 }
 0x3d5   :  { %v1141_v34 = vpop.f32.mrb[24].mxu1 }
 0x3d6   :  { %v700_v36 = vadd.f32 %v1141_v34, %v954_v18  ;;  %v691_v37 = vpop.f32.mrb[25].mxu1  ;;  %749 = vmax.xlane.f32.xlu0 %v729_v35 }
 0x3d7   :  { %v1142_v39 = vpop.f32.mrb[26].mxu1  ;;  %751 = vmax.xlane.f32.xlu1 %v730_v38  ;;  %v692_v43 = vadd.f32 %v954_v18, %v691_v37 }
 0x3d8   :  { %v703_v40 = vadd.f32 %v1142_v39, %v954_v18  ;;  %v694_v41 = vpop.f32.mrb[27].mxu1  ;;  %v735_v42 = vsel %vm724_vm0, %v700_v36, -1e+30 }
 0x3d9   :  { %v695_v44 = vadd.f32 %v954_v18, %v694_v41  ;;  %v1437_v54 = vsel %vm724_vm0, %v692_v43, -1e+30 }
 0x3da   :  { %761 = vmax.xlane.f32.xlu0 %v735_v42  ;;  %v736_v45 = vsel %vm724_vm0, %v703_v40, -1e+30 }
 0x3db   :  { %763 = vmax.xlane.f32.xlu1 %v736_v45  ;;  %v1442_v57 = vsel %vm724_vm0, %v695_v44, -1e+30 }
 0x3dd   :  { %v1145_v46 = vpop.f32.mrb[28].mxu1 }
 0x3de   :  { %v707_v55 = vpop.f32.mrb[29].mxu1  ;;  %757 = vmax.xlane.f32.xlu0 %v1437_v54  ;;  %v716_v61 = vadd.f32 %v1145_v46, %v954_v18 }
 0x3df   :  { %v708_v58 = vadd.f32 %v954_v18, %v707_v55  ;;  %v1146_v59 = vpop.f32.mrb[30].mxu1  ;;  %759 = vmax.xlane.f32.xlu1 %v1442_v57 }
 0x3e0   :  { %v710_v60 = vpop.f32.mrb[31].mxu1  ;;  %v719_v0 = vadd.f32 %v1146_v59, %v954_v18  ;;  %v1457_v1 = vsel %vm724_vm0, %v716_v61, -1e+30 }
 0x3e1   :  { %v711_v62 = vadd.f32 %v954_v18, %v710_v60  ;;  %v1447_v63 = vsel %vm724_vm0, %v708_v58, -1e+30 }
 0x3e2   :  { %765 = vmax.xlane.f32.xlu0 %v1447_v63  ;;  %v1462_v2 = vsel %vm724_vm0, %v719_v0, -1e+30 }
 0x3e3   :  { %v1452_v56 = vsel %vm724_vm0, %v711_v62, -1e+30 }
 0x3e4   :  { %767 = vmax.xlane.f32.xlu1 %v1452_v56 }
 0x3e6   :  { %769 = vmax.xlane.f32.xlu0 %v1457_v1 }
 0x3e8   :  { %771 = vmax.xlane.f32.xlu1 %v1462_v2 }
 0x456   :  { %v746_v3 = vpop.xlane.xlu1 %745 }
 0x457   :  { %v1465_v4 = vsub.f32 %v727_v52, %v746_v3  ;;  %v742_v5 = vpop.xlane.xlu0 %741 }
 0x458   :  { %v1467_v6 = vsub.f32 %v725_v21, %v742_v5 }
 0x459   :  { %v793_v7 = vmul.f32 1.442695, %v1465_v4 }
 0x45a   :  { %v789_v8 = vmul.f32 1.442695, %v1467_v6  ;;  %v748_v9 = vpop.xlane.xlu1 %747 }
 0x45b   :  { %1179 = vpow2.f32 %v793_v7  ;;  %v1471_v10 = vsub.f32 %v728_v22, %v748_v9  ;;  %v744_v11 = vpop.xlane.xlu0 %743 }
 0x45c   :  { %v1473_v12 = vsub.f32 %v726_v24, %v744_v11  ;;  %1181 = vpow2.f32 %v789_v8 }
 0x45d   :  { %v795_v13 = vmul.f32 1.442695, %v1471_v10 }
 0x45e   :  { %v791_v14 = vmul.f32 1.442695, %v1473_v12 }
 0x45f   :  { %1183 = vpow2.f32 %v795_v13  ;;  %v754_v15 = vpop.xlane.xlu0 %753 }
 0x460   :  { %v1477_v16 = vsub.f32 %v731_v30, %v754_v15  ;;  %v756_v17 = vpop.xlane.xlu1 %755  ;;  %1185 = vpow2.f32 %v791_v14 }
 0x461   :  { %v1479_v18 = vsub.f32 %v732_v33, %v756_v17 }
 0x462   :  { %v801_v47 = vmul.f32 1.442695, %v1477_v16 }
 0x463   :  { %v803_v48 = vmul.f32 1.442695, %v1479_v18  ;;  %v750_v49 = vpop.xlane.xlu0 %749 }
 0x464   :  { %1187 = vpow2.f32 %v801_v47  ;;  %v1483_v19 = vsub.f32 %v729_v35, %v750_v49  ;;  %v752_v50 = vpop.xlane.xlu1 %751 }
 0x465   :  { %v1180_v20 = vpop.eup %1179  ;;  %v1485_v51 = vsub.f32 %v730_v38, %v752_v50  ;;  %1189 = vpow2.f32 %v803_v48 }
 0x466   :  { %v797_v52 = vmul.f32 1.442695, %v1483_v19  ;;  %825 = vadd.xlane.f32.xlu0 %v1180_v20  ;;  %v1182_v22 = vpop.eup %1181 }
 0x467   :  { %v799_v53 = vmul.f32 1.442695, %v1485_v51  ;;  %v762_v21 = vpop.xlane.xlu0 %761 }
 0x468   :  { %1191 = vpow2.f32 %v797_v52  ;;  %v1489_v23 = vsub.f32 %v735_v42, %v762_v21  ;;  %v764_v24 = vpop.xlane.xlu1 %763 }
 0x469   :  { %v1184_v25 = vpop.eup %1183  ;;  %v1491_v26 = vsub.f32 %v736_v45, %v764_v24  ;;  %1193 = vpow2.f32 %v799_v53 }
 0x46a   :  { %v809_v27 = vmul.f32 1.442695, %v1489_v23  ;;  %827 = vadd.xlane.f32.xlu1 %v1184_v25  ;;  %821 = vadd.xlane.f32.xlu0 %v1182_v22  ;;  %v1186_v32 = vpop.eup %1185 }
 0x46b   :  { %v811_v28 = vmul.f32 1.442695, %v1491_v26  ;;  %v758_v29 = vpop.xlane.xlu0 %757 }
 0x46c   :  { %1195 = vpow2.f32 %v809_v27  ;;  %v1496_v30 = vsub.f32 %v1437_v54, %v758_v29  ;;  %v760_v31 = vpop.xlane.xlu1 %759 }
 0x46d   :  { %v1499_v33 = vsub.f32 %v1442_v57, %v760_v31  ;;  %1197 = vpow2.f32 %v811_v28 }
 0x46e   :  { %v1188_v34 = vpop.eup %1187  ;;  %v805_v35 = vmul.f32 1.442695, %v1496_v30  ;;  %823 = vadd.xlane.f32.xlu1 %v1186_v32 }
 0x46f   :  { %v807_v36 = vmul.f32 1.442695, %v1499_v33  ;;  %833 = vadd.xlane.f32.xlu0 %v1188_v34  ;;  %v766_v37 = vpop.xlane.xlu0 %765  ;;  %v1190_v39 = vpop.eup %1189 }
 0x470   :  { %1199 = vpow2.f32 %v805_v35  ;;  %v1504_v38 = vsub.f32 %v1447_v63, %v766_v37 }
 0x471   :  { %v768_v40 = vpop.xlane.xlu1 %767  ;;  %1201 = vpow2.f32 %v807_v36 }
 0x472   :  { %v1192_v41 = vpop.eup %1191  ;;  %v813_v42 = vmul.f32 1.442695, %v1504_v38  ;;  %v1508_v43 = vsub.f32 %v1452_v56, %v768_v40  ;;  %835 = vadd.xlane.f32.xlu1 %v1190_v39 }
 0x473   :  { %829 = vadd.xlane.f32.xlu0 %v1192_v41  ;;  %v770_v44 = vpop.xlane.xlu0 %769  ;;  %v1194_v54 = vpop.eup %1193 }
 0x474   :  { %1203 = vpow2.f32 %v813_v42  ;;  %v815_v45 = vmul.f32 1.442695, %v1508_v43  ;;  %v1512_v46 = vsub.f32 %v1457_v1, %v770_v44 }
 0x475   :  { %v772_v55 = vpop.xlane.xlu1 %771 }
 0x476   :  { %v1196_v57 = vpop.eup %1195  ;;  %1205 = vpow2.f32 %v815_v45  ;;  %v817_v58 = vmul.f32 1.442695, %v1512_v46  ;;  %v1516_v59 = vsub.f32 %v1462_v2, %v772_v55  ;;  %831 = vadd.xlane.f32.xlu1 %v1194_v54 }
 0x477   :  { %841 = vadd.xlane.f32.xlu0 %v1196_v57  ;;  %v1198_v61 = vpop.eup %1197 }
 0x478   :  { %1207 = vpow2.f32 %v817_v58  ;;  %v819_v60 = vmul.f32 1.442695, %v1516_v59 }
 0x47a   :  { %v1200_v62 = vpop.eup %1199  ;;  %1209 = vpow2.f32 %v819_v60  ;;  %843 = vadd.xlane.f32.xlu1 %v1198_v61 }
 0x47b   :  { %837 = vadd.xlane.f32.xlu0 %v1200_v62  ;;  %v1202_v63 = vpop.eup %1201 }
 0x47e   :  { %v1204_v0 = vpop.eup %1203  ;;  %839 = vadd.xlane.f32.xlu1 %v1202_v63 }
 0x47f   :  { %845 = vadd.xlane.f32.xlu0 %v1204_v0 }
 0x480   :  { %v1206_v56 = vpop.eup %1205 }
 0x482   :  { %v1208_v1 = vpop.eup %1207  ;;  %847 = vadd.xlane.f32.xlu1 %v1206_v56 }
 0x483   :  { %849 = vadd.xlane.f32.xlu0 %v1208_v1 }
 0x484   :  { %v1210_v2 = vpop.eup %1209 }
 0x486   :  { %851 = vadd.xlane.f32.xlu1 %v1210_v2 }
 0x4f3   :  { %v826_v3 = vpop.xlane.xlu0 %825 }
 0x4f4   :  { %1211 = vlog2.f32 %v826_v3 }
 0x4f7   :  { %v828_v5 = vpop.xlane.xlu1 %827  ;;  %v822_v7 = vpop.xlane.xlu0 %821 }
 0x4f8   :  { %1213 = vlog2.f32 %v828_v5 }
 0x4f9   :  { %1215 = vlog2.f32 %v822_v7 }
 0x4fb   :  { %v824_v8 = vpop.xlane.xlu1 %823 }
 0x4fc   :  { %1217 = vlog2.f32 %v824_v8  ;;  %v834_v9 = vpop.xlane.xlu0 %833 }
 0x4fd   :  { %1219 = vlog2.f32 %v834_v9 }
 0x4fe   :  { %v1212_v11 = vpop.eup %1211 }
 0x4ff   :  { %v858_v13 = vmul.f32 0.6931472, %v1212_v11  ;;  %v836_v14 = vpop.xlane.xlu1 %835 }
 0x500   :  { %1221 = vlog2.f32 %v836_v14  ;;  %v830_v15 = vpop.xlane.xlu0 %829 }
 0x501   :  { %v887_v17 = vsub.f32 %v1465_v4, %v858_v13  ;;  %1223 = vlog2.f32 %v830_v15 }
 0x502   :  { %v1214_v47 = vpop.eup %1213 }
 0x503   :  { %v1216_v48 = vpop.eup %1215  ;;  %903 = vst [vmem:[%s1589_s6 + $0x10] sm:$0xff] %v887_v17  ;;  %v860_v49 = vmul.f32 0.6931472, %v1214_v47  ;;  %v832_v50 = vpop.xlane.xlu1 %831 }
 0x504   :  { %v854_v20 = vmul.f32 0.6931472, %v1216_v48  ;;  %1225 = vlog2.f32 %v832_v50  ;;  %v842_v52 = vpop.xlane.xlu0 %841 }
 0x505   :  { %v888_v53 = vsub.f32 %v1471_v10, %v860_v49  ;;  %1227 = vlog2.f32 %v842_v52 }
 0x506   :  { %v1218_v21 = vpop.eup %1217  ;;  %v885_v22 = vsub.f32 %v1467_v6, %v854_v20 }
 0x507   :  { %v1220_v24 = vpop.eup %1219  ;;  %904 = vst [vmem:[%s1589_s6 + $0x18] sm:$0xff] %v888_v53  ;;  %v856_v4 = vmul.f32 0.6931472, %v1218_v21  ;;  %v844_v25 = vpop.xlane.xlu1 %843 }
 0x508   :  { %901 = vst [vmem:[%s1589_s6] sm:$0xff] %v885_v22  ;;  %v866_v27 = vmul.f32 0.6931472, %v1220_v24  ;;  %1229 = vlog2.f32 %v844_v25  ;;  %v838_v28 = vpop.xlane.xlu0 %837 }
 0x509   :  { %v886_v10 = vsub.f32 %v1473_v12, %v856_v4  ;;  %1231 = vlog2.f32 %v838_v28 }
 0x50a   :  { %v1222_v29 = vpop.eup %1221  ;;  %v891_v6 = vsub.f32 %v1477_v16, %v866_v27 }
 0x50b   :  { %v1224_v31 = vpop.eup %1223  ;;  %902 = vst [vmem:[%s1589_s6 + $0x8] sm:$0xff] %v886_v10  ;;  %v868_v32 = vmul.f32 0.6931472, %v1222_v29  ;;  %v840_v34 = vpop.xlane.xlu1 %839 }
 0x50c   :  { %907 = vst [vmem:[%s1589_s6 + $0x30] sm:$0xff] %v891_v6  ;;  %v862_v35 = vmul.f32 0.6931472, %v1224_v31  ;;  %1233 = vlog2.f32 %v840_v34  ;;  %v846_v36 = vpop.xlane.xlu0 %845 }
 0x50d   :  { %v892_v12 = vsub.f32 %v1479_v18, %v868_v32  ;;  %1235 = vlog2.f32 %v846_v36 }
 0x50e   :  { %v1226_v37 = vpop.eup %1225  ;;  %v889_v16 = vsub.f32 %v1483_v19, %v862_v35 }
 0x50f   :  { %v1228_v39 = vpop.eup %1227  ;;  %908 = vst [vmem:[%s1589_s6 + $0x38] sm:$0xff] %v892_v12  ;;  %v864_v40 = vmul.f32 0.6931472, %v1226_v37  ;;  %v848_v41 = vpop.xlane.xlu1 %847 }
 0x510   :  { %905 = vst [vmem:[%s1589_s6 + $0x20] sm:$0xff] %v889_v16  ;;  %v874_v42 = vmul.f32 0.6931472, %v1228_v39  ;;  %1237 = vlog2.f32 %v848_v41  ;;  %v850_v44 = vpop.xlane.xlu0 %849 }
 0x511   :  { %v890_v18 = vsub.f32 %v1485_v51, %v864_v40  ;;  %1239 = vlog2.f32 %v850_v44 }
 0x512   :  { %v1230_v45 = vpop.eup %1229  ;;  %v895_v19 = vsub.f32 %v1489_v23, %v874_v42 }
 0x513   :  { %v1232_v54 = vpop.eup %1231  ;;  %906 = vst [vmem:[%s1589_s6 + $0x28] sm:$0xff] %v890_v18  ;;  %v876_v55 = vmul.f32 0.6931472, %v1230_v45  ;;  %v852_v57 = vpop.xlane.xlu1 %851 }
 0x514   :  { %911 = vst [vmem:[%s1589_s6 + $0x50] sm:$0xff] %v895_v19  ;;  %v870_v58 = vmul.f32 0.6931472, %v1232_v54  ;;  %1241 = vlog2.f32 %v852_v57 }
 0x515   :  { %v896_v60 = vsub.f32 %v1491_v26, %v876_v55 }
 0x516   :  { %v1234_v51 = vpop.eup %1233  ;;  %v893_v61 = vsub.f32 %v1496_v30, %v870_v58 }
 0x517   :  { %v1236_v62 = vpop.eup %1235  ;;  %912 = vst [vmem:[%s1589_s6 + $0x58] sm:$0xff] %v896_v60  ;;  %v872_v23 = vmul.f32 0.6931472, %v1234_v51 }
 0x518   :  { %909 = vst [vmem:[%s1589_s6 + $0x40] sm:$0xff] %v893_v61  ;;  %v878_v63 = vmul.f32 0.6931472, %v1236_v62 }
 0x519   :  { %v894_v0 = vsub.f32 %v1499_v33, %v872_v23 }
 0x51a   :  { %v1238_v56 = vpop.eup %1237  ;;  %v897_v1 = vsub.f32 %v1504_v38, %v878_v63 }
 0x51b   :  { %v1240_v26 = vpop.eup %1239  ;;  %910 = vst [vmem:[%s1589_s6 + $0x48] sm:$0xff] %v894_v0  ;;  %v880_v30 = vmul.f32 0.6931472, %v1238_v56 }
 0x51c   :  { %913 = vst [vmem:[%s1589_s6 + $0x60] sm:$0xff] %v897_v1  ;;  %v882_v2 = vmul.f32 0.6931472, %v1240_v26 }
 0x51d   :  { %v898_v3 = vsub.f32 %v1508_v43, %v880_v30 }
 0x51e   :  { %v1242_v5 = vpop.eup %1241  ;;  %v899_v7 = vsub.f32 %v1512_v46, %v882_v2 }
 0x51f   :  { %914 = vst [vmem:[%s1589_s6 + $0x68] sm:$0xff] %v898_v3  ;;  %v884_v33 = vmul.f32 0.6931472, %v1242_v5 }
 0x520   :  { %915 = vst [vmem:[%s1589_s6 + $0x70] sm:$0xff] %v899_v7 }
 0x521   :  { %v900_v38 = vsub.f32 %v1516_v59, %v884_v33 }
 0x523   :  { %916 = vst [vmem:[%s1589_s6 + $0x78] sm:$0xff] %v900_v38 }

</bundles_post_ra>
